<compile_context>
chip_gen: v7x
topology: tpu7x:2x2x1
jax: 0.10.0
libtpu: 0.0.40
codegen_flags: <defaults>
</compile_context>

<pallas_src>
import jax
import jax.numpy as jnp
from jax import lax
from jax.experimental import pallas as pl
from jax.experimental.pallas import tpu as pltpu


def skipgram_kernel(idx_ref, embt_ref, out_ref):
    embt = embt_ref[...]                 # (D, V) bf16 — resident table, batch on MXU N dim
    idx = idx_ref[...]                   # (1, 2*TB) int32: [target tile | context tile]

    v = embt.shape[1]
    two_tb = idx.shape[1]
    tb = two_tb // 2

    # Fused one-hot gather on the MXU: (D, V) @ (V, 2*TB) -> (D, 2*TB), f32 accumulate.
    # Single iota+compare+cast covers both gathers (half the VPU work of two gathers).
    row = lax.broadcasted_iota(jnp.int32, (v, two_tb), 0)          # vocab id per sublane
    onehot = (row == idx).astype(embt.dtype)                       # bf16 0/1 (exact)
    gathered = jnp.dot(embt, onehot, preferred_element_type=jnp.float32)   # (D, 2*TB) f32

    tgt_e = gathered[:, :tb]             # (D, TB) — lane slice at a 128-aligned boundary
    ctx_e = gathered[:, tb:]             # (D, TB)

    # scores = sum over embedding dim (sublane / XLU reduce) -> lane-dense (1, TB) row
    out_ref[...] = jnp.sum(tgt_e * ctx_e, axis=0, keepdims=True).astype(out_ref.dtype)


def skipgram_forward(target, context, embeddings=None, *, embeddings_t=None,
                     batch_tile=512):
    """target, context: int [B]; embeddings: [V, D] (or embeddings_t: [D, V], bf16).

    Returns f32 scores [B]. Pass a pre-transposed/pre-cast `embeddings_t` to hoist
    the table transpose + bf16 cast out of the per-call path (v5e HBM bandwidth).
    """
    assert batch_tile % 128 == 0, "batch_tile must be a multiple of 128 (lane-dense)"
    if embeddings_t is None:
        embeddings_t = embeddings.astype(jnp.bfloat16).T            # (D, V)
    embt = embeddings_t.astype(jnp.bfloat16)
    d, v = embt.shape
    b = target.shape[0]

    # Fewer, fatter grid steps, but keep the grid >= 2 tiles and EVEN so v7x's two
    # TensorCores stay balanced under dimension_semantics=("parallel",).
    bt = batch_tile
    while bt > 128 and pl.cdiv(b, bt) < 2:
        bt //= 2
    nt = pl.cdiv(b, bt)
    nt += nt % 2
    b_pad = nt * bt

    # Pad batch (index 0; padded results are sliced off) and pack per-tile
    # [target | context] so each grid step loads ONE lane-dense (1, 2*bt) index row.
    tgt = jnp.zeros((b_pad,), jnp.int32).at[:b].set(target.astype(jnp.int32))
    ctx = jnp.zeros((b_pad,), jnp.int32).at[:b].set(context.astype(jnp.int32))
    idx = jnp.concatenate([tgt.reshape(nt, bt), ctx.reshape(nt, bt)], axis=1)
    idx = idx.reshape(1, nt * 2 * bt)

    # VMEM budget: single-buffered bf16 table + double-buffered idx/out blocks +
    # one-hot / iota / gathered temporaries. Headroom x4, capped for v7x (64 MiB).
    vmem_est = (d * v * 2                      # resident bf16 table (Buffered(1))
                + 2 * (2 * bt) * 4             # idx blocks (2 buffers, int32)
                + 2 * bt * 4                   # out blocks (2 buffers, f32)
                + v * 2 * bt * (2 + 4)         # onehot bf16 + iota int32
                + d * 2 * bt * 4)              # gathered f32
    vmem_limit = int(min(max(4 * vmem_est, 4 << 20), 48 << 20))

    flops = 2 * d * v * (2 * b_pad) + 2 * b_pad * d      # gather matmul + mul/sum
    bytes_accessed = embt.size * 2 + idx.size * 4 + b_pad * 4

    out = pl.pallas_call(
        skipgram_kernel,
        out_shape=jax.ShapeDtypeStruct((1, b_pad), jnp.float32),
        grid_spec=pltpu.PrefetchScalarGridSpec(
            num_scalar_prefetch=0,
            grid=(nt,),
            in_specs=[
                # lane-dense index row for this tile: [tgt | ctx]
                pl.BlockSpec((1, 2 * bt), lambda i: (0, i)),
                # full transposed bf16 table, resident across the grid; constant
                # index_map => never re-fetched, Buffered(1) => no second buffer.
                pl.BlockSpec((d, v), lambda i: (0, 0),
                             pipeline_mode=pl.Buffered(1)),
            ],
            # lane-dense score row per tile
            out_specs=pl.BlockSpec((1, bt), lambda i: (0, i)),
        ),
        compiler_params=pltpu.CompilerParams(
            dimension_semantics=("parallel",),       # batch axis shards across v7x's 2 TCs
            vmem_limit_bytes=vmem_limit,
        ),
        cost_estimate=pl.CostEstimate(
            flops=flops, transcendentals=0, bytes_accessed=bytes_accessed
        ),
    )(idx, embt)

    return out.reshape(b_pad)[:b]


if __name__ == "__main__":
    vocab_size = 64
    embedding_dim = 32
    batch = 500          # not a multiple of the tile -> exercises padding + adaptive tile

    key = jax.random.PRNGKey(0)
    k_emb, k_tgt, k_ctx = jax.random.split(key, 3)

    # nn.Embedding weight initialized uniform_(-1, 1)
    embeddings = jax.random.uniform(
        k_emb, (vocab_size, embedding_dim), dtype=jnp.float32, minval=-1.0, maxval=1.0
    )
    target = jax.random.randint(k_tgt, (batch,), 0, vocab_size, dtype=jnp.int32)
    context = jax.random.randint(k_ctx, (batch,), 0, vocab_size, dtype=jnp.int32)

    # Hoist the table transpose + bf16 cast out of the per-call path (perf review).
    embt = embeddings.astype(jnp.bfloat16).T            # (D, V)

    fwd = jax.jit(skipgram_forward, static_argnames=("batch_tile",))
    scores = fwd(target, context, embeddings_t=embt, batch_tile=512)
    scores = jax.block_until_ready(scores)

    # Pure-JAX reference using the same bf16-rounded table (kernel accumulates in f32).
    emb_bf = embeddings.astype(jnp.bfloat16).astype(jnp.float32)
    ref = jnp.sum(emb_bf[target] * emb_bf[context], axis=1)

    assert scores.shape == (batch,)
    assert jnp.allclose(scores, ref, atol=1e-4, rtol=1e-4), (
        float(jnp.max(jnp.abs(scores - ref)))
    )

    print("KERNEL_OK")
</pallas_src>

<mosaic_0001>
module attributes {stable_mosaic.version = 11 : i64} {
  func.func @skipgram_kernel(%arg0: i32, %arg1: memref<1x512xi32, #tpu.memory_space<vmem>>, %arg2: memref<32x64xbf16, #tpu.memory_space<vmem>>, %arg3: memref<1x256xf32, #tpu.memory_space<vmem>>) attributes {dimension_semantics = [#tpu.dimension_semantics<parallel>], iteration_bounds = array<i64: 2>, scalar_prefetch = 0 : i64, scratch_operands = 0 : i64, tpu.core_type = #tpu.core_type<tc>, window_params = [{transform_indices = @transform_0, window_bounds = array<i64: 1, 512>}, {pipeline_mode = #tpu.pipeline_mode<synchronous>, transform_indices = @transform_1, window_bounds = array<i64: 32, 64>}, {transform_indices = @transform_2, window_bounds = array<i64: 1, 256>}]} {
    %c0 = arith.constant 0 : index
    %c0_0 = arith.constant 0 : index
    %0 = vector.load %arg2[%c0, %c0_0] : memref<32x64xbf16, #tpu.memory_space<vmem>>, vector<32x64xbf16>
    %c0_1 = arith.constant 0 : index
    %c0_2 = arith.constant 0 : index
    %1 = vector.load %arg1[%c0_1, %c0_2] : memref<1x512xi32, #tpu.memory_space<vmem>>, vector<1x512xi32>
    %2 = tpu.iota {dimensions = array<i32: 0>} : vector<64x512xi32>
    %3 = vector.broadcast %1 : vector<1x512xi32> to vector<64x512xi32>
    %4 = arith.cmpi eq, %2, %3 : vector<64x512xi32>
    %5 = arith.extui %4 : vector<64x512xi1> to vector<64x512xi32>
    %6 = arith.sitofp %5 : vector<64x512xi32> to vector<64x512xf32>
    %7 = arith.truncf %6 : vector<64x512xf32> to vector<64x512xbf16>
    %cst = arith.constant dense<0.000000e+00> : vector<32x512xf32>
    %8 = tpu.matmul %0, %7, %cst {dimension_numbers = #tpu.dot_dimension_numbers<[1], [0], [0], [1], [0, 0, 1, 1], [], []>} : vector<32x64xbf16>, vector<64x512xbf16>, vector<32x512xf32> -> vector<32x512xf32>
    %9 = vector.extract_strided_slice %8 {offsets = [0, 0], sizes = [32, 256], strides = [1, 1]} : vector<32x512xf32> to vector<32x256xf32>
    %10 = vector.extract_strided_slice %8 {offsets = [0, 256], sizes = [32, 256], strides = [1, 1]} : vector<32x512xf32> to vector<32x256xf32>
    %11 = arith.mulf %9, %10 : vector<32x256xf32>
    %cst_3 = arith.constant dense<0.000000e+00> : vector<256xf32>
    %12 = vector.multi_reduction <add>, %11, %cst_3 [0] : vector<32x256xf32> to vector<256xf32>
    %13 = vector.shape_cast %12 : vector<256xf32> to vector<1x256xf32>
    %c0_4 = arith.constant 0 : index
    %c0_5 = arith.constant 0 : index
    %14 = vector.load %arg3[%c0_4, %c0_5] : memref<1x256xf32, #tpu.memory_space<vmem>>, vector<1x256xf32>
    tpu.vector_store %arg3[%c0_4, %c0_5], %13 {strides = array<i32>} : memref<1x256xf32, #tpu.memory_space<vmem>>, vector<1x256xf32>,
    return
  }
  func.func @transform_0(%arg0: i32) -> (i32, i32) {
    %c0_i32 = arith.constant 0 : i32
    %c0_i32_0 = arith.constant 0 : i32
    return %c0_i32, %arg0 : i32, i32
  }
  func.func @transform_1(%arg0: i32) -> (i32, i32) {
    %c0_i32 = arith.constant 0 : i32
    %c0_i32_0 = arith.constant 0 : i32
    %c0_i32_1 = arith.constant 0 : i32
    return %c0_i32, %c0_i32_0 : i32, i32
  }
  func.func @transform_2(%arg0: i32) -> (i32, i32) {
    %c0_i32 = arith.constant 0 : i32
    %c0_i32_0 = arith.constant 0 : i32
    return %c0_i32, %arg0 : i32, i32
  }
}

</mosaic_0001>

<bundles_post_ra>
// kernel: skipgram_forward.1
= control target key start
LH: loop header
LB: loop body
LE: loop exit
PB: predicated region body
PF: predicated region fallthrough
CT: control target
= control target key end

     0   :  { %7 = vsyncpa [#allocation3], 0  ;;  %s906_s0 = inlined_call_operand.vmem [shape: s32[1,1024], index: 0, kind: input, shape index: {}]   ;;  %s907_s1 = inlined_call_operand.vmem [shape: bf16[32,64], index: 1, kind: input, shape index: {}]   ;;  %s908_s2 = inlined_call_operand.hbm [shape: f32[1,512], index: 2, kind: output, shape index: {}]  }
   0x1   :  { %9 = vsyncpa [#allocation3 + $0x1], 0  ;;  %s737_s9 = smov 0   ;;  %s739_s10 = smov 0  }
   0x2   :  { %s741_s11 = smov 0   ;;  %s743_s12 = smov 0  }
   0x3 LB: > { %s758_s13 = sadd.s32 4294967295, %s716_s12   ;;  %s528_s14 = sadd.s32 4294967294, %s716_s12   ;;  %s716_s12 = sphi %s743_s12, %s914_s12   ;;  %s712_s11 = sphi %s741_s11, %s913_s11   ;;  %s708_s10 = sphi %s739_s10, %s912_s10   ;;  %s704_s9 = sphi %s737_s9, %s911_s9  }
   0x4   : > { %s762_s15 = sadd.s32 1, %s716_s12   ;;  %s69_s16 = sadd.s32 1, %s712_s11 }
   0x5   : > { %s66_s17 = ssub.s32 %s716_s12, %s762_s15  ;;  %p79_p0 = scmp.ne.s32.totalorder %s712_s11, %s708_s10 }
   0x6   : > { %p67_p1 = scmp.eq.s32.totalorder %s66_s17, 0  ;;  %p80_p2 = scmp.eq.s32.totalorder %s758_s13, 1 }
   0x7   : > { %p85_p3 = scmp.ne.s32.totalorder %s708_s10, %s704_s9  ;;  %p86_p4 = scmp.eq.s32.totalorder %s528_s14, 1 }
   0x8   : > { %s773_s18 = scalar_select %p67_p1, %s712_s11, %s69_s16  }
   0x9   : > { %p775_p5 = por %p80_p2, %p79_p0  ;;  %p779_p6 = por %p86_p4, %p85_p3 }
   0xa   : > { %p531_p7 = scmp.ge.s32.totalorder %s716_s12, 1  ;;  %p115_p8 = scmp.lt.s32.totalorder %s716_s12, 3 }
   0xc   : > { %p116_p9 = pnand %p531_p7, %p115_p8 }
   0xd   : > { %s533_s21 = sshll.u32 (!%p116_p9), %s758_s13, 2  ;;  %v148_v0 = vlaneseq (!%p116_p9)  ;;  %v718_v1 = vmov (!%p116_p9), 0   ;;  %v719_v15 = vmov (!%p116_p9), 1.0|1.0   ;;  %v652_v20 = vld [vmem:[%s907_s1] sm:$0xff] (!%p116_p9)   ;;  %v653_v21 = vld [vmem:[%s907_s1 + $0x8] sm:$0xff] (!%p116_p9)  }
   0xe   : > { %119 = sbr.rel (%p116_p9) target bundleno = 305 (0x131), region = 28  ;;  %p137_p10 = scmp.lt.s32.totalorder (!%p116_p9), %s533_s21, 7  ;;  %334 = vmatprep.mubr.bf16.mxu0 (!%p116_p9), %v718_v1  ;;  %387 = vmatprep.mubr.bf16.mxu1 (!%p116_p9), %v718_v1  ;;  %v720_v56 = vmov (!%p116_p9), 1966171168  }
   0xf   : > { %v789_v2 = vshrl.u32 (!%p116_p9), %v148_v0, 7  ;;  %v438_v57 = vunpack.c.l.s4 (!%p116_p9), %v720_v56  ;;  %s133_s29 = sand.u32 (!%p116_p9), 1, %s708_s10   ;;  %s609_s3 = sshll.u32 (!%p116_p9), %s758_s13, 5 }
  0x10   : > { %s532_s30 = sshll.u32 (!%p116_p9), %s133_s29, 1  ;;  %s864_s8 = scalar_lea.hbm (!%p116_p9), %s908_s2, %s609_s3 }
  0x11   : > { %v163_v3 = vsub.s32 (!%p116_p9), 1, %v789_v2  ;;  %v171_v4 = vsub.s32 (!%p116_p9), 3, %v789_v2  ;;  %v159_v5 = vsub.s32 (!%p116_p9), 0, %v789_v2  ;;  %v150_v6 = vadd.s32 (!%p116_p9), 8, %v789_v2  ;;  %s135_s4 = scalar_lea.vmem (!%p116_p9), [#allocation2], %s532_s30  ;;  %s458_s14 = scalar_lea.sflag (!%p116_p9), [#allocation3], %s133_s29 }
  0x12   : > { %v167_v7 = vsub.s32 (!%p116_p9), 2, %v789_v2  ;;  %v151_v9 = vadd.s32 (!%p116_p9), 16, %v789_v2  ;;  %v152_v10 = vadd.s32 (!%p116_p9), 24, %v789_v2  ;;  %v153_v16 = vadd.s32 (!%p116_p9), 32, %v789_v2  ;;  %s472_s5 = sshll.u32 (!%p116_p9), %s135_s4, 4  ;;  %s721_s13 = smov (!%p116_p9), [#allocation2]   ;;  %s866_s5 = int_to_ptr.vmem [resolvable:$true] %s472_s5 }
  0x13   : > { %v154_v17 = vadd.s32 (!%p116_p9), 40, %v789_v2  ;;  %v155_v18 = vadd.s32 (!%p116_p9), 48, %v789_v2  ;;  %v156_v19 = vadd.s32 (!%p116_p9), 56, %v789_v2  ;;  %v439_v62 = vunpack.c.0.s8 (!%p116_p9), %v438_v57  ;;  %s654_s16 = scalar_lea.vmem (!%p116_p9), %s866_s5, 32  ;;  %s658_s17 = sshll.u32 (!%p116_p9), %s721_s13, 4  ;;  %s659_s17 = int_to_ptr.vmem [resolvable:$false] %s658_s17 }
  0x14   : > { %p655_p11 = scmp.ne.s32.totalorder (!%p116_p9), %s866_s5, %s654_s16  ;;  %p661_p0 = scmp.lt.s32.totalorder (!%p116_p9), %s866_s5, %s659_s17 }
  0x15   : > { %s916_s21 = smov (!%p137_p10, %s533_s21), 7 }
  0x16   : > { %s139_s24 = scalar_lea.vmem %s906_s0, %s916_s21  ;;  %p656_p12 = pnand %p655_p11, %p775_p5 }
  0x17   : > { %v147_v8 = vld [vmem:[%s139_s24] sm:$0xf]  ;;  %s660_s21 = scalar_lea.vmem %s659_s17, 64 }
  0x18   : > { %v801_v11 = vrot.slane %v147_v8, %v163_v3  ;;  %v803_v12 = vrot.slane %v147_v8, %v171_v4  ;;  %v805_v13 = vrot.slane %v147_v8, %v159_v5  ;;  %v807_v14 = vrot.slane %v147_v8, %v167_v7  ;;  %p657_p13 = pneg %p656_p12  ;;  %p662_p1 = scmp.lt.s32.totalorder %s660_s21, %s654_s16 }
  0x19   : > { %v442_v5 = vsub.s32 %v439_v62, %v789_v2 }
  0x1a   : > { %vm174_vm0 = vcmp.eq.s32.totalorder %v789_v2, %v801_v11  ;;  %vm178_vm1 = vcmp.eq.s32.totalorder %v150_v6, %v801_v11  ;;  %vm176_vm2 = vcmp.eq.s32.totalorder %v789_v2, %v803_v12  ;;  %vm180_vm3 = vcmp.eq.s32.totalorder %v150_v6, %v803_v12  ;;  %p663_p2 = por %p662_p1, %p661_p0 }
  0x1b   : > { %vm568_vm4 = vmpackc.low %vm178_vm1, %vm174_vm0  ;;  %vm173_vm5 = vcmp.eq.s32.totalorder %v789_v2, %v805_v13  ;;  %vm177_vm6 = vcmp.eq.s32.totalorder %v150_v6, %v805_v13  ;;  %vm175_vm7 = vcmp.eq.s32.totalorder %v789_v2, %v807_v14  ;;  %vm179_vm8 = vcmp.eq.s32.totalorder %v150_v6, %v807_v14 }
  0x1c   : > { %569 = vmatprep.subr.msk.bf16.mxu0 %vm568_vm4, %v719_v15  ;;  %vm586_vm9 = vmpackc.low %vm180_vm3, %vm176_vm2  ;;  %vm182_vm10 = vcmp.eq.s32.totalorder %v151_v9, %v801_v11  ;;  %vm186_vm11 = vcmp.eq.s32.totalorder %v152_v10, %v801_v11  ;;  %vm184_vm13 = vcmp.eq.s32.totalorder %v151_v9, %v803_v12  ;;  %vm188_vm14 = vcmp.eq.s32.totalorder %v152_v10, %v803_v12  ;;  %p664_p3 = pnand %p663_p2, %p657_p13 }
  0x1d   : > { %587 = vmatprep.subr.msk.bf16.mxu1 %vm586_vm9, %v719_v15  ;;  %vm570_vm12 = vmpackc.low %vm177_vm6, %vm173_vm5  ;;  %vm181_vm0 = vcmp.eq.s32.totalorder %v151_v9, %v805_v13  ;;  %vm185_vm1 = vcmp.eq.s32.totalorder %v152_v10, %v805_v13  ;;  %vm183_vm3 = vcmp.eq.s32.totalorder %v151_v9, %v807_v14  ;;  %vm187_vm4 = vcmp.eq.s32.totalorder %v152_v10, %v807_v14 }
  0x1e   : > { %571 = vmatpush1.bf16.msk.msra.mxu0 %vm570_vm12, %v719_v15  ;;  %vm588_vm15 = vmpackc.low %vm179_vm8, %vm175_vm7  ;;  %vm190_vm5 = vcmp.eq.s32.totalorder %v153_v16, %v801_v11  ;;  %vm194_vm6 = vcmp.eq.s32.totalorder %v154_v17, %v801_v11  ;;  %vm192_vm8 = vcmp.eq.s32.totalorder %v153_v16, %v803_v12  ;;  %vm189_vm12 = vcmp.eq.s32.totalorder %v153_v16, %v805_v13 }
  0x1f   : > { %589 = vmatpush1.bf16.msk.msra.mxu1 %vm588_vm15, %v719_v15  ;;  %vm572_vm2 = vmpackc.low %vm186_vm11, %vm182_vm10  ;;  %vm196_vm10 = vcmp.eq.s32.totalorder %v154_v17, %v803_v12  ;;  %vm191_vm15 = vcmp.eq.s32.totalorder %v153_v16, %v807_v14 }
  0x20   : > { %573 = vmatprep.subr.msk.bf16.mxu0 %vm572_vm2, %v719_v15  ;;  %vm590_vm9 = vmpackc.low %vm188_vm14, %vm184_vm13  ;;  %vm193_vm13 = vcmp.eq.s32.totalorder %v154_v17, %v805_v13  ;;  %vm195_vm2 = vcmp.eq.s32.totalorder %v154_v17, %v807_v14 }
  0x21   : > { %591 = vmatprep.subr.msk.bf16.mxu1 %vm590_vm9, %v719_v15  ;;  %vm574_vm7 = vmpackc.low %vm185_vm1, %vm181_vm0  ;;  %vm198_vm0 = vcmp.eq.s32.totalorder %v155_v18, %v801_v11  ;;  %vm202_vm1 = vcmp.eq.s32.totalorder %v156_v19, %v801_v11 }
  0x22   : > { %575 = vmatpush1.bf16.msk.msra.mxu0 %vm574_vm7, %v719_v15  ;;  %vm592_vm11 = vmpackc.low %vm187_vm4, %vm183_vm3  ;;  %vm200_vm3 = vcmp.eq.s32.totalorder %v155_v18, %v803_v12  ;;  %vm204_vm4 = vcmp.eq.s32.totalorder %v156_v19, %v803_v12 }
  0x23   : > { %593 = vmatpush1.bf16.msk.msra.mxu1 %vm592_vm11, %v719_v15  ;;  %vm576_vm14 = vmpackc.low %vm194_vm6, %vm190_vm5  ;;  %vm197_vm5 = vcmp.eq.s32.totalorder %v155_v18, %v805_v13  ;;  %vm201_vm6 = vcmp.eq.s32.totalorder %v156_v19, %v805_v13 }
  0x24   : > { %577 = vmatprep.subr.msk.bf16.mxu0 %vm576_vm14, %v719_v15  ;;  %vm594_vm9 = vmpackc.low %vm196_vm10, %vm192_vm8  ;;  %vm199_vm8 = vcmp.eq.s32.totalorder %v155_v18, %v807_v14  ;;  %vm203_vm10 = vcmp.eq.s32.totalorder %v156_v19, %v807_v14 }
  0x25   : > { %595 = vmatprep.subr.msk.bf16.mxu1 %vm594_vm9, %v719_v15  ;;  %vm578_vm7 = vmpackc.low %vm193_vm13, %vm189_vm12 }
  0x26   : > { %579 = vmatpush1.bf16.msk.msra.mxu0 %vm578_vm7, %v719_v15  ;;  %vm596_vm11 = vmpackc.low %vm195_vm2, %vm191_vm15  ;;  %vm295_vm15 = vcmask 523264   ;;  %vm454_vm2 = vcmp.lt.s32.totalorder %v148_v0, 256 }
  0x27   : > { %597 = vmatpush1.bf16.msk.msra.mxu1 %vm596_vm11, %v719_v15  ;;  %vm580_vm14 = vmpackc.low %vm202_vm1, %vm198_vm0 }
  0x28   : > { %581 = vmatprep.subr.msk.bf16.mxu0 %vm580_vm14, %v719_v15  ;;  %vm598_vm9 = vmpackc.low %vm204_vm4, %vm200_vm3 }
  0x29   : > { %599 = vmatprep.subr.msk.bf16.mxu1 %vm598_vm9, %v719_v15  ;;  %vm582_vm12 = vmpackc.low %vm201_vm6, %vm197_vm5 }
  0x2a   : > { %583 = vmatpush1.bf16.msk.msra.mxu0 %vm582_vm12, %v719_v15  ;;  %vm600_vm13 = vmpackc.low %vm203_vm10, %vm199_vm8 }
  0x2b   : > { %601 = vmatpush1.bf16.msk.msra.mxu1 %vm600_vm13, %v719_v15 }
  0x2d   : > { %584 = vmatmul.mubr.msk.bf16.vlgmr.msra.gmra.mrb[0].mxu0 %vm295_vm15, %v652_v20 }
  0x2e   : > { %602 = vmatmul.mubr.msk.bf16.vlgmr.msra.gmra.mrb[0].mxu1 %vm295_vm15, %v652_v20  ;;  %344 = vmatprep.mubr.bf16.mxu0 %v718_v1 }
  0x2f   : > { %397 = vmatprep.mubr.bf16.mxu1 %v718_v1 }
  0x35   : > { %585 = vmatmul.mubr.msk.bf16.gmra.mrb[4].mxu0 %vm295_vm15, %v653_v21 }
  0x36   : > { %603 = vmatmul.mubr.msk.bf16.gmra.mrb[4].mxu1 %vm295_vm15, %v653_v21 }
 0x100   : > { %v336_v22 = vpop.f32.mrb[0].mxu0 }
 0x101   : > { %v389_v23 = vpop.f32.mrb[0].mxu1  ;;  %v338_v24 = vpop.f32.mrb[1].mxu0 }
 0x102   : > { %v408_v25 = vmul.f32 %v389_v23, %v336_v22  ;;  %v391_v26 = vpop.f32.mrb[1].mxu1  ;;  %v340_v27 = vpop.f32.mrb[2].mxu0 }
 0x103   : > { %v409_v28 = vmul.f32 %v391_v26, %v338_v24  ;;  %v393_v29 = vpop.f32.mrb[2].mxu1  ;;  %v342_v30 = vpop.f32.mrb[3].mxu0 }
 0x104   : > { %v410_v31 = vmul.f32 %v393_v29, %v340_v27  ;;  %v395_v32 = vpop.f32.mrb[3].mxu1 }
 0x105   : > { %v411_v33 = vmul.f32 %v395_v32, %v342_v30 }
 0x106   : > { %v416_v34 = vadd.f32 %v410_v31, %v408_v25 }
 0x107   : > { %v425_v35 = vadd.f32 %v411_v33, %v409_v28 }
 0x108   : > { %v346_v36 = vpop.f32.mrb[4].mxu0 }
 0x109   : > { %v399_v37 = vpop.f32.mrb[4].mxu1  ;;  %v348_v38 = vpop.f32.mrb[5].mxu0 }
 0x10a   : > { %v412_v39 = vmul.f32 %v399_v37, %v346_v36  ;;  %v401_v40 = vpop.f32.mrb[5].mxu1  ;;  %v350_v41 = vpop.f32.mrb[6].mxu0 }
 0x10b   : > { %v413_v42 = vmul.f32 %v401_v40, %v348_v38  ;;  %v403_v43 = vpop.f32.mrb[6].mxu1  ;;  %v352_v44 = vpop.f32.mrb[7].mxu0 }
 0x10c   : > { %v417_v45 = vadd.f32 %v416_v34, %v412_v39  ;;  %v414_v46 = vmul.f32 %v403_v43, %v350_v41  ;;  %v405_v47 = vpop.f32.mrb[7].mxu1 }
 0x10d   : > { %v426_v48 = vadd.f32 %v425_v35, %v413_v42  ;;  %v415_v49 = vmul.f32 %v405_v47, %v352_v44 }
 0x10e   : > { %v418_v50 = vadd.f32 %v417_v45, %v414_v46 }
 0x10f   : > { %v427_v51 = vadd.f32 %v426_v48, %v415_v49 }
 0x110   : > { %v419_v52 = vrot.slane %v418_v50, 4 }
 0x111   : > { %v428_v53 = vrot.slane %v427_v51, 4 }
 0x112   : > { %v420_v54 = vadd.f32 %v419_v52, %v418_v50 }
 0x113   : > { %v429_v55 = vadd.f32 %v428_v53, %v427_v51 }
 0x114   : > { %v421_v58 = vrot.slane %v420_v54, 2 }
 0x115   : > { %v430_v59 = vrot.slane %v429_v55, 2 }
 0x116   : > { %v422_v60 = vadd.f32 %v421_v58, %v420_v54 }
 0x117   : > { %v431_v61 = vadd.f32 %v430_v59, %v429_v55 }
 0x118   : > { %v423_v63 = vrot.slane %v422_v60, 1 }
 0x119   : > { %v432_v1 = vrot.slane %v431_v61, 1 }
 0x11a   : > { %v424_v3 = vadd.f32 %v423_v63, %v422_v60 }
 0x11b   : > { %v433_v4 = vadd.f32 %v432_v1, %v431_v61 }
 0x11d   : > { %v436_v6 = vcombine.low %v424_v3, %v433_v4 }
 0x11f   : > { %v443_v7 = vrot.slane %v436_v6, %v442_v5 }
 0x121   : > { %v450_v8 = vrot.slane %v443_v7, %v442_v5 }
 0x123   : > { %456 = vst.msk [vmem:[%s135_s4] sm:$0x3] %vm454_vm2, %v450_v8 }
 0x124   : > { %667 = shalt.err (!%p664_p3)
}
 0x125   : > { %s668_s22 = scalar_lea.hbm %s864_s8, 32  ;;  %s672_s25 = scalar_lea.hbm %s908_s2, 64 }
 0x126   : > { %p669_p4 = scmp.ne.s32.totalorder %s864_s8, %s668_s22  ;;  %p673_p9 = scmp.lt.u32.totalorder %s864_s8, %s908_s2 }
 0x127   : > { %p674_p10 = scmp.lt.u32.totalorder %s672_s25, %s668_s22  ;;  %p676_p12 = scmp.lt.u32.totalorder %s668_s22, %s864_s8 }
 0x128   : > { %p670_p7 = pnand %p669_p4, %p775_p5 }
 0x129   : > { %p675_p11 = por %p674_p10, %p673_p9 }
 0x12a   : > { %p671_p8 = pneg %p670_p7 }
 0x12b   : > { %p677_p13 = por %p676_p12, %p675_p11 }
 0x12d   : > { %p678_p0 = pnand %p677_p13, %p671_p8 }
 0x12f   : > { %681 = shalt.err (!%p678_p0)
}
 0x130   : > { %610 = dma.vmem_to_hbm [thread:$0]  (%p775_p5), %s866_s5, 32, %s864_s8, %s458_s14  }
 0x131 PF: > { %p616_p1 = scmp.ge.s32.totalorder %s716_s12, 2  ;;  %s484_s28 = sand.u32 1, %s704_s9  }
 0x132   : > { %s485_s29 = scalar_lea.sflag [#allocation3], %s484_s28 }
 0x133   : > { %p613_p2 = pnand %p616_p1, %p779_p6 }
 0x135   : > { %699 = dma.done.wait (!%p613_p2), %s485_s29, 32  }
 0x136   : > { %701 = vsyncadd (!%p613_p2), %s485_s29, 4294967264  ;;  %p12_p3 = scmp.ge.s32.totalorder %s762_s15, 4   ;;  %s911_s9 = smov %s708_s10 }
 0x137   : > { %s912_s10 = smov %s712_s11  ;;  %s913_s11 = smov %s773_s18 }
 0x138   : > { %s914_s12 = smov %s762_s15  ;;  %14 = sbr.rel (!%p12_p3) target bundleno = 3 (0x3), region = 63 }
 0x13f   :  { %490 = vsyncpa [#allocation3], 1 }
 0x140   :  { %492 = vsyncpa [#allocation3 + $0x1], 1 }

</bundles_post_ra>
